<compile_context>
chip_gen: v7x
topology: tpu7x:2x2x1
jax: 0.10.0
libtpu: 0.0.40
codegen_flags: <defaults>
</compile_context>

<pallas_src>
import functools

import jax
import jax.numpy as jnp
from jax import lax
from jax.experimental import pallas as pl
from jax.experimental.pallas import tpu as pltpu


def _round_up(x, m):
    return ((x + m - 1) // m) * m


# ----------------------------------------------------------------------------
# Pallas kernels
# ----------------------------------------------------------------------------
def _mm_bias_act_kernel(x_ref, w_ref, b_ref, o_ref, acc_ref, *, neg_slope):
    """Tiled matmul: f32 accumulator across the K grid axis; the bias add and
    (optional) LeakyReLU epilogue run only on the last K step so the inner loop
    is pure MXU accumulate."""
    k = pl.program_id(2)

    @pl.when(k == 0)
    def _():
        acc_ref[...] = jnp.zeros_like(acc_ref)

    acc_ref[...] += jnp.dot(x_ref[...], w_ref[...],
                            preferred_element_type=jnp.float32)

    @pl.when(k == pl.num_programs(2) - 1)
    def _():
        acc = acc_ref[...] + b_ref[...]
        if neg_slope is not None:
            acc = jnp.where(acc > 0, acc, neg_slope * acc)
        o_ref[...] = acc.astype(o_ref.dtype)


def _inorm_lrelu_kernel(x_ref, o_ref, *, eps, neg_slope, inv_hw):
    """InstanceNorm over the spatial axis of a (1, H*W, Cb) block + LeakyReLU.

    Single centered pass: mean, then reuse (x - mean) for both the variance
    and the normalization (~1.5 sweeps over VMEM instead of 3).
    """
    x = x_ref[...]
    mean = jnp.sum(x, axis=1, keepdims=True) * inv_hw
    xc = x - mean
    var = jnp.sum(xc * xc, axis=1, keepdims=True) * inv_hw
    y = xc * lax.rsqrt(var + eps)
    o_ref[...] = jnp.where(y > 0, y, neg_slope * y).astype(o_ref.dtype)


# ----------------------------------------------------------------------------
# Layer wrappers
# ----------------------------------------------------------------------------
def conv2d(x_nhwc, w_hwio, b, *, stride, padding, neg_slope=None):
    """Conv2d (cross-correlation, same as nn.Conv2d) via fused patch extraction
    + tiled Pallas matmul (bf16 MXU inputs, f32 accumulate)."""
    N, H, W, Cin = x_nhwc.shape
    KH, KW, _, Cout = w_hwio.shape
    Ho = (H + 2 * padding - KH) // stride + 1
    Wo = (W + 2 * padding - KW) // stride + 1

    # Single fused XLA op; patch-channel order is (cin, kh, kw).  bf16 halves
    # HBM bytes for the expanded slab and feeds the MXU at its bf16 peak.
    patches = lax.conv_general_dilated_patches(
        x_nhwc.astype(jnp.bfloat16), (KH, KW), (stride, stride),
        [(padding, padding), (padding, padding)],
        dimension_numbers=("NHWC", "HWIO", "NHWC"))
    M = N * Ho * Wo
    Kd = Cin * KH * KW
    patches = patches.reshape(M, Kd)
    # Match the (cin, kh, kw) patch feature order.
    wm = jnp.transpose(w_hwio, (2, 0, 1, 3)).reshape(Kd, Cout).astype(jnp.bfloat16)

    # Tile sizes.  Output is always lane-dense (Cout padded to a multiple of
    # 128) so stores are unmasked full-lane vst; tiles are capped at 512 so the
    # working set (2 bf16 inputs x 2 bufs + f32 acc + f32 out x 2 bufs ~ 4 MiB)
    # stays far under the 32 MiB scoped-VMEM budget even on v7x.
    tm = min(512, _round_up(M, 8))
    tk = min(512, _round_up(Kd, 128))
    tn = min(256, _round_up(Cout, 128))
    Mp = _round_up(M, tm)
    Kp = _round_up(Kd, tk)
    Np = _round_up(Cout, tn)

    patches = jnp.pad(patches, ((0, Mp - M), (0, Kp - Kd)))
    wm = jnp.pad(wm, ((0, Kp - Kd), (0, Np - Cout)))
    bm = jnp.pad(b.astype(jnp.float32).reshape(1, Cout), ((0, 0), (0, Np - Cout)))

    grid = (Mp // tm, Np // tn, Kp // tk)
    flops = 2 * M * Kd * Cout
    bytes_accessed = patches.size * 2 + wm.size * 2 + bm.size * 4 + Mp * Np * 4

    out = pl.pallas_call(
        functools.partial(_mm_bias_act_kernel, neg_slope=neg_slope),
        out_shape=jax.ShapeDtypeStruct((Mp, Np), jnp.float32),
        grid=grid,
        in_specs=[
            pl.BlockSpec((tm, tk), lambda i, j, k: (i, k)),
            pl.BlockSpec((tk, tn), lambda i, j, k: (k, j)),
            pl.BlockSpec((1, tn), lambda i, j, k: (0, j)),
        ],
        out_specs=pl.BlockSpec((tm, tn), lambda i, j, k: (i, j)),
        scratch_shapes=[pltpu.VMEM((tm, tn), jnp.float32)],
        compiler_params=pltpu.CompilerParams(
            dimension_semantics=("parallel", "parallel", "arbitrary"),
            vmem_limit_bytes=32 * 1024 * 1024),
        cost_estimate=pl.CostEstimate(
            flops=flops, transcendentals=0, bytes_accessed=bytes_accessed),
    )(patches, wm, bm)

    # Slice away M / lane padding (XLA glue) and restore NHWC.
    return out[:M, :Cout].reshape(N, Ho, Wo, Cout)


def instance_norm_lrelu(x_nhwc, *, eps=1e-5, neg_slope=0.2):
    """InstanceNorm2d (affine=False, biased var) fused with LeakyReLU."""
    N, H, W, C = x_nhwc.shape
    HW = H * W
    xf = x_nhwc.reshape(N, HW, C)
    # Lane-dense channel blocks when C is a multiple of 128; otherwise the full
    # (small) channel extent.  grid=(N, C//cb) gives the pipeline more steps to
    # overlap DMA with the reduction and more parallel work for v7x megacore.
    cb = 128 if C % 128 == 0 else C
    grid = (N, C // cb)
    # Note: for very large H*W a two-pass / running-stats spatial split would be
    # needed to bound VMEM; unnecessary at PatchGAN feature-map sizes.
    out = pl.pallas_call(
        functools.partial(_inorm_lrelu_kernel, eps=eps, neg_slope=neg_slope,
                          inv_hw=1.0 / HW),
        out_shape=jax.ShapeDtypeStruct((N, HW, C), jnp.float32),
        grid=grid,
        in_specs=[pl.BlockSpec((1, HW, cb), lambda n, c: (n, 0, c))],
        out_specs=pl.BlockSpec((1, HW, cb), lambda n, c: (n, 0, c)),
        compiler_params=pltpu.CompilerParams(
            dimension_semantics=("parallel", "parallel"),
            vmem_limit_bytes=32 * 1024 * 1024),
    )(xf)
    return out.reshape(N, H, W, C)


# ----------------------------------------------------------------------------
# PatchGAN: parameter init + forward
# ----------------------------------------------------------------------------
def init_patchgan_params(key, in_channels=3, base_features=64, num_downs=3):
    """Deterministic synthetic params matching the PyTorch module's shapes."""
    specs = []  # (cin, cout, ksize, stride, padding, normalize, activation)
    feats = base_features
    specs.append((in_channels, feats, 4, 2, 1, False, True))
    cin = feats
    for _ in range(1, num_downs):
        specs.append((cin, feats * 2, 4, 2, 1, True, True))
        cin = feats * 2
        feats *= 2
    specs.append((cin, 1, 3, 1, 1, False, False))  # final conv, no norm/act

    params = []
    for (ci, co, k, s, p, norm, act) in specs:
        key, kw, kb = jax.random.split(key, 3)
        fan_in = ci * k * k
        w = jax.random.normal(kw, (k, k, ci, co), jnp.float32) / jnp.sqrt(fan_in)
        b = 0.01 * jax.random.normal(kb, (co,), jnp.float32)
        params.append(dict(w=w, b=b, stride=s, padding=p, norm=norm, act=act))
    return params


def patchgan_forward(params, x_nchw):
    # NCHW -> NHWC for the kernels, back to NCHW at the end (PyTorch convention).
    x = jnp.transpose(x_nchw, (0, 2, 3, 1))
    for layer in params:
        if layer["norm"]:
            # Conv -> InstanceNorm -> LeakyReLU (norm block): activation lives
            # in the instance-norm kernel.
            x = conv2d(x, layer["w"], layer["b"], stride=layer["stride"],
                       padding=layer["padding"], neg_slope=None)
            x = instance_norm_lrelu(x, eps=1e-5, neg_slope=0.2)
        elif layer["act"]:
            # Conv -> LeakyReLU fused in the matmul epilogue.
            x = conv2d(x, layer["w"], layer["b"], stride=layer["stride"],
                       padding=layer["padding"], neg_slope=0.2)
        else:
            # Final plain conv (Cout=1; computed lane-dense, sliced in wrapper).
            x = conv2d(x, layer["w"], layer["b"], stride=layer["stride"],
                       padding=layer["padding"], neg_slope=None)
    return jnp.transpose(x, (0, 3, 1, 2))


# ----------------------------------------------------------------------------
# Pure-JAX reference (for correctness check only)
# ----------------------------------------------------------------------------
def patchgan_reference(params, x_nchw):
    x = x_nchw
    for layer in params:
        w_oihw = jnp.transpose(layer["w"], (3, 2, 0, 1))
        p = layer["padding"]
        x = lax.conv_general_dilated(
            x, w_oihw, (layer["stride"],) * 2, [(p, p), (p, p)],
            dimension_numbers=("NCHW", "OIHW", "NCHW"),
            precision=lax.Precision.HIGHEST)
        x = x + layer["b"][None, :, None, None]
        if layer["norm"]:
            mean = jnp.mean(x, axis=(2, 3), keepdims=True)
            var = jnp.var(x, axis=(2, 3), keepdims=True)
            x = (x - mean) / jnp.sqrt(var + 1e-5)
        if layer["act"]:
            x = jnp.where(x > 0, x, 0.2 * x)
    return x


if __name__ == "__main__":
    key = jax.random.PRNGKey(0)
    kx, kp = jax.random.split(key)

    # Small shapes consistent with the module: N=2, C_in=3, 16x16 spatial,
    # base_features=16, num_downs=3  ->  output (2, 1, 2, 2).
    x = jax.random.normal(kx, (2, 3, 16, 16), jnp.float32)
    params = init_patchgan_params(kp, in_channels=3, base_features=16, num_downs=3)

    out = patchgan_forward(params, x)
    out = jax.block_until_ready(out)

    ref = patchgan_reference(params, x)
    assert out.shape == (2, 1, 2, 2), out.shape
    # bf16 MXU inputs (f32 accumulate) across 4 stacked convs: allow a few e-2.
    assert jnp.allclose(out, ref, atol=5e-2, rtol=5e-2), (
        float(jnp.max(jnp.abs(out - ref))))

    print("KERNEL_OK")
</pallas_src>

<mosaic_0001>
module attributes {stable_mosaic.version = 11 : i64} {
  func.func @_mm_bias_act_kernel(%arg0: i32, %arg1: i32, %arg2: i32, %arg3: memref<128x128xbf16, #tpu.memory_space<vmem>>, %arg4: memref<128x128xbf16, #tpu.memory_space<vmem>>, %arg5: memref<1x128xf32, #tpu.memory_space<vmem>>, %arg6: memref<128x128xf32, #tpu.memory_space<vmem>>, %arg7: memref<128x128xf32, #tpu.memory_space<vmem>>) attributes {dimension_semantics = [#tpu.dimension_semantics<parallel>, #tpu.dimension_semantics<parallel>, #tpu.dimension_semantics<arbitrary>], iteration_bounds = array<i64: 1, 1, 1>, scalar_prefetch = 0 : i64, scratch_operands = 1 : i64, tpu.core_type = #tpu.core_type<tc>, window_params = [{transform_indices = @transform_0, window_bounds = array<i64: 128, 128>}, {transform_indices = @transform_1, window_bounds = array<i64: 128, 128>}, {transform_indices = @transform_2, window_bounds = array<i64: 1, 128>}, {transform_indices = @transform_3, window_bounds = array<i64: 128, 128>}]} {
    %c0_i32 = arith.constant 0 : i32
    %0 = arith.cmpi eq, %arg2, %c0_i32 : i32
    %1 = arith.extui %0 : i1 to i32
    %c0_i32_0 = arith.constant 0 : i32
    %2 = arith.cmpi ne, %1, %c0_i32_0 : i32
    scf.if %2 {
      %cst_10 = arith.constant 0.000000e+00 : f32
      %12 = vector.broadcast %cst_10 : f32 to vector<128x128xf32>
      %c0_11 = arith.constant 0 : index
      %c0_12 = arith.constant 0 : index
      %13 = vector.load %arg7[%c0_11, %c0_12] : memref<128x128xf32, #tpu.memory_space<vmem>>, vector<128x128xf32>
      tpu.vector_store %arg7[%c0_11, %c0_12], %12 {strides = array<i32>} : memref<128x128xf32, #tpu.memory_space<vmem>>, vector<128x128xf32>,
    } else {
    }
    %c0 = arith.constant 0 : index
    %c0_1 = arith.constant 0 : index
    %3 = vector.load %arg7[%c0, %c0_1] : memref<128x128xf32, #tpu.memory_space<vmem>>, vector<128x128xf32>
    %c0_2 = arith.constant 0 : index
    %c0_3 = arith.constant 0 : index
    %4 = vector.load %arg3[%c0_2, %c0_3] : memref<128x128xbf16, #tpu.memory_space<vmem>>, vector<128x128xbf16>
    %c0_4 = arith.constant 0 : index
    %c0_5 = arith.constant 0 : index
    %5 = vector.load %arg4[%c0_4, %c0_5] : memref<128x128xbf16, #tpu.memory_space<vmem>>, vector<128x128xbf16>
    %cst = arith.constant dense<0.000000e+00> : vector<128x128xf32>
    %6 = tpu.matmul %4, %5, %cst {dimension_numbers = #tpu.dot_dimension_numbers<[1], [0], [0], [1], [0, 0, 1, 1], [], []>} : vector<128x128xbf16>, vector<128x128xbf16>, vector<128x128xf32> -> vector<128x128xf32>
    %7 = arith.addf %3, %6 : vector<128x128xf32>
    %c0_6 = arith.constant 0 : index
    %c0_7 = arith.constant 0 : index
    %8 = vector.load %arg7[%c0_6, %c0_7] : memref<128x128xf32, #tpu.memory_space<vmem>>, vector<128x128xf32>
    tpu.vector_store %arg7[%c0_6, %c0_7], %7 {strides = array<i32>} : memref<128x128xf32, #tpu.memory_space<vmem>>, vector<128x128xf32>,
    %c0_i32_8 = arith.constant 0 : i32
    %9 = arith.cmpi eq, %arg2, %c0_i32_8 : i32
    %10 = arith.extui %9 : i1 to i32
    %c0_i32_9 = arith.constant 0 : i32
    %11 = arith.cmpi ne, %10, %c0_i32_9 : i32
    scf.if %11 {
      %c0_10 = arith.constant 0 : index
      %c0_11 = arith.constant 0 : index
      %12 = vector.load %arg7[%c0_10, %c0_11] : memref<128x128xf32, #tpu.memory_space<vmem>>, vector<128x128xf32>
      %c0_12 = arith.constant 0 : index
      %c0_13 = arith.constant 0 : index
      %13 = vector.load %arg5[%c0_12, %c0_13] : memref<1x128xf32, #tpu.memory_space<vmem>>, vector<1x128xf32>
      %14 = vector.broadcast %13 : vector<1x128xf32> to vector<128x128xf32>
      %15 = arith.addf %12, %14 : vector<128x128xf32>
      %cst_14 = arith.constant 0.000000e+00 : f32
      %16 = vector.broadcast %cst_14 : f32 to vector<128x128xf32>
      %17 = arith.cmpf ogt, %15, %16 : vector<128x128xf32>
      %cst_15 = arith.constant 2.000000e-01 : f32
      %18 = vector.broadcast %cst_15 : f32 to vector<128x128xf32>
      %19 = arith.mulf %18, %15 : vector<128x128xf32>
      %20 = arith.select %17, %15, %19 : vector<128x128xi1>, vector<128x128xf32>
      %c0_16 = arith.constant 0 : index
      %c0_17 = arith.constant 0 : index
      %21 = vector.load %arg6[%c0_16, %c0_17] : memref<128x128xf32, #tpu.memory_space<vmem>>, vector<128x128xf32>
      tpu.vector_store %arg6[%c0_16, %c0_17], %20 {strides = array<i32>} : memref<128x128xf32, #tpu.memory_space<vmem>>, vector<128x128xf32>,
    } else {
    }
    return
  }
  func.func @transform_0(%arg0: i32, %arg1: i32, %arg2: i32) -> (i32, i32) {
    %c0_i32 = arith.constant 0 : i32
    return %arg0, %arg2 : i32, i32
  }
  func.func @transform_1(%arg0: i32, %arg1: i32, %arg2: i32) -> (i32, i32) {
    %c0_i32 = arith.constant 0 : i32
    return %arg2, %arg1 : i32, i32
  }
  func.func @transform_2(%arg0: i32, %arg1: i32, %arg2: i32) -> (i32, i32) {
    %c0_i32 = arith.constant 0 : i32
    %c0_i32_0 = arith.constant 0 : i32
    return %c0_i32, %arg1 : i32, i32
  }
  func.func @transform_3(%arg0: i32, %arg1: i32, %arg2: i32) -> (i32, i32) {
    %c0_i32 = arith.constant 0 : i32
    return %arg0, %arg1 : i32, i32
  }
}

</mosaic_0001>

<bundles_post_ra>
// kernel: tpu_custom_call.1
= control target key start
LH: loop header
LB: loop body
LE: loop exit
PB: predicated region body
PF: predicated region fallthrough
CT: control target
= control target key end

     0   :  { %8 = vsyncpa [#allocation4], 0  ;;  %s721_s0 = inlined_call_operand.hbm [shape: bf16[128,128], index: 0, kind: input, shape index: {}]   ;;  %s722_s1 = inlined_call_operand.hbm [shape: bf16[128,128], index: 1, kind: input, shape index: {}]   ;;  %s723_s2 = inlined_call_operand.vmem [shape: f32[1,128], index: 2, kind: input, shape index: {}]   ;;  %s724_s3 = inlined_call_operand.hbm [shape: f32[128,128], index: 3, kind: output, shape index: {}]  }
   0x1   :  { %9 = vsyncpa [#allocation7], 0 }
   0x2   :  { %10 = vsyncpa [#allocation5], 0  ;;  %s637_s12 = smov [#allocation3]   ;;  %s565_s16 = scalar_lea.hbm %s721_s0, 1024 }
   0x3   :  { %s16_s13 = sshll.u32 %s637_s12, 4  ;;  %p566_p0 = scmp.ne.s32.totalorder %s721_s0, %s565_s16  ;;  %s17_s13 = int_to_ptr.vmem [resolvable:$true] %s16_s13 }
   0x4   :  { %p569_p1 = scmp.lt.u32.totalorder %s565_s16, %s721_s0 }
   0x6   :  { %p571_p2 = pnand %p569_p1, %p566_p0 }
   0x8   :  { %574 = shalt.err (!%p571_p2)
}
   0x9   :  { %s575_s21 = scalar_lea.vmem %s17_s13, 1024  ;;  %p580_p4 = scmp.lt.s32.totalorder %s17_s13, %s17_s13 }
   0xa   :  { %p576_p3 = scmp.ne.s32.totalorder %s17_s13, %s575_s21  ;;  %p581_p5 = scmp.lt.s32.totalorder %s575_s21, %s575_s21 }
   0xc   :  { %p582_p6 = por %p581_p5, %p580_p4 }
   0xe   :  { %p583_p7 = pnand %p582_p6, %p576_p3 }
  0x10   :  { %586 = shalt.err (!%p583_p7)
}
  0x11   :  { %s638_s22 = smov 64   ;;  %s639_s23 = smov 4  }
  0x12   :  { %22 = dma.hbm_to_vmem [thread:$0]  %s721_s0, 1024, %s17_s13, [#allocation4], %s638_s22, %s638_s22, %s639_s23  }
  0x13   :  { %s640_s26 = smov [#allocation6]   ;;  %s587_s30 = scalar_lea.hbm %s722_s1, 1024 }
  0x14   :  { %s28_s27 = sshll.u32 %s640_s26, 4  ;;  %p588_p8 = scmp.ne.s32.totalorder %s722_s1, %s587_s30  ;;  %s29_s27 = int_to_ptr.vmem [resolvable:$true] %s28_s27 }
  0x15   :  { %p591_p9 = scmp.lt.u32.totalorder %s587_s30, %s722_s1 }
  0x17   :  { %p593_p10 = pnand %p591_p9, %p588_p8 }
  0x19   :  { %596 = shalt.err (!%p593_p10)
}
  0x1a   :  { %s597_s8 = scalar_lea.vmem %s29_s27, 1024  ;;  %p602_p12 = scmp.lt.s32.totalorder %s29_s27, %s29_s27 }
  0x1b   :  { %p598_p11 = scmp.ne.s32.totalorder %s29_s27, %s597_s8  ;;  %p603_p13 = scmp.lt.s32.totalorder %s597_s8, %s597_s8 }
  0x1d   :  { %p604_p0 = por %p603_p13, %p602_p12 }
  0x1f   :  { %p605_p1 = pnand %p604_p0, %p598_p11 }
  0x21   :  { %608 = shalt.err (!%p605_p1)
}
  0x22   :  { %34 = dma.hbm_to_vmem [thread:$0]  %s722_s1, 1024, %s29_s27, [#allocation7], %s638_s22, %s638_s22, %s639_s23  }
  0x23   :  { %631 = dma.done.wait [#allocation4], 1024  }
  0x24   :  { %632 = vsyncadd [#allocation4], 4294966272 }
  0x25   :  { %633 = dma.done.wait [#allocation7], 1024  }
  0x26   :  { %634 = vsyncadd [#allocation7], 4294966272  ;;  %v549_v0 = vld [vmem:[#allocation6] sm:$0xff]   ;;  %v550_v1 = vld [vmem:[#allocation6 + $0x8] sm:$0xff]  }
  0x27   :  { %494 = vmatprep.subr.bf16.mxu0 %v549_v0  ;;  %526 = vmatprep.subr.bf16.mxu1 %v549_v0  ;;  %v551_v2 = vld [vmem:[#allocation6 + $0x10] sm:$0xff]   ;;  %v552_v3 = vld [vmem:[#allocation6 + $0x18] sm:$0xff]   ;;  %v557_v4 = vld [vmem:[#allocation3] sm:$0xff]  }
  0x28   :  { %495 = vmatpush3.bf16.msra.mxu0 %v549_v0  ;;  %534 = vmatpush3.bf16.msra.mxu1 %v549_v0  ;;  %v558_v5 = vld [vmem:[#allocation3 + $0x20] sm:$0xff]   ;;  %v554_v7 = vld [vmem:[#allocation6 + $0x28] sm:$0xff]   ;;  %v555_v8 = vld [vmem:[#allocation6 + $0x30] sm:$0xff]  }
  0x29   :  { %496 = vmatprep.subr.bf16.mxu0 %v550_v1  ;;  %527 = vmatprep.subr.bf16.mxu1 %v550_v1  ;;  %v553_v6 = vld [vmem:[#allocation6 + $0x20] sm:$0xff]   ;;  %v556_v9 = vld [vmem:[#allocation6 + $0x38] sm:$0xff]   ;;  %v559_v10 = vld [vmem:[#allocation3 + $0x8] sm:$0xff]  }
  0x2a   :  { %510 = vmatprep.mubr.bf16.mxu0 %v557_v4  ;;  %518 = vmatprep.mubr.bf16.mxu1 %v558_v5  ;;  %v560_v11 = vld [vmem:[#allocation3 + $0x28] sm:$0xff]   ;;  %v561_v12 = vld [vmem:[#allocation3 + $0x10] sm:$0xff]   ;;  %v563_v14 = vld [vmem:[#allocation3 + $0x18] sm:$0xff]  }
  0x2b   :  { %v562_v13 = vld [vmem:[#allocation3 + $0x30] sm:$0xff]   ;;  %v564_v15 = vld [vmem:[#allocation3 + $0x38] sm:$0xff]   ;;  %v691_v16 = vld [vmem:[%s723_s2] ss:$0 sm:$0xff]  ;;  %s641_s2 = smov [#allocation8]  }
  0x2c   :  { %497 = vmatpush3.bf16.msra.mxu0 %v550_v1  ;;  %535 = vmatpush3.bf16.msra.mxu1 %v550_v1  ;;  %s448_s11 = sshll.u32 %s641_s2, 4  ;;  %s449_s11 = int_to_ptr.vmem [resolvable:$true] %s448_s11 }
  0x2d   :  { %498 = vmatprep.subr.bf16.mxu0 %v551_v2  ;;  %528 = vmatprep.subr.bf16.mxu1 %v551_v2  ;;  %s609_s12 = scalar_lea.vmem %s449_s11, 2048  ;;  %p614_p3 = scmp.lt.s32.totalorder %s449_s11, %s449_s11 }
  0x2e   :  { %p610_p2 = scmp.ne.s32.totalorder %s449_s11, %s609_s12  ;;  %p615_p4 = scmp.lt.s32.totalorder %s609_s12, %s609_s12 }
  0x30   :  { %499 = vmatpush3.bf16.msra.mxu0 %v551_v2  ;;  %536 = vmatpush3.bf16.msra.mxu1 %v551_v2  ;;  %p616_p5 = por %p615_p4, %p614_p3 }
  0x31   :  { %500 = vmatprep.subr.bf16.mxu0 %v552_v3  ;;  %529 = vmatprep.subr.bf16.mxu1 %v552_v3 }
  0x32   :  { %p617_p6 = pnand %p616_p5, %p610_p2 }
  0x34   :  { %501 = vmatpush3.bf16.msra.mxu0 %v552_v3  ;;  %537 = vmatpush3.bf16.msra.mxu1 %v552_v3 }
  0x35   :  { %502 = vmatprep.subr.bf16.mxu0 %v553_v6  ;;  %530 = vmatprep.subr.bf16.mxu1 %v553_v6 }
  0x38   :  { %503 = vmatpush3.bf16.msra.mxu0 %v553_v6  ;;  %538 = vmatpush3.bf16.msra.mxu1 %v553_v6 }
  0x39   :  { %504 = vmatprep.subr.bf16.mxu0 %v554_v7  ;;  %531 = vmatprep.subr.bf16.mxu1 %v554_v7 }
  0x3c   :  { %505 = vmatpush3.bf16.msra.mxu0 %v554_v7  ;;  %539 = vmatpush3.bf16.msra.mxu1 %v554_v7 }
  0x3d   :  { %506 = vmatprep.subr.bf16.mxu0 %v555_v8  ;;  %532 = vmatprep.subr.bf16.mxu1 %v555_v8 }
  0x40   :  { %507 = vmatpush3.bf16.msra.mxu0 %v555_v8  ;;  %540 = vmatpush3.bf16.msra.mxu1 %v555_v8 }
  0x41   :  { %508 = vmatprep.subr.bf16.mxu0 %v556_v9  ;;  %533 = vmatprep.subr.bf16.mxu1 %v556_v9 }
  0x44   :  { %509 = vmatpush3.bf16.msra.mxu0 %v556_v9  ;;  %541 = vmatpush3.bf16.msra.mxu1 %v556_v9 }
  0x47   :  { %511 = vmatmul.mubr.bf16.vlgmr.msra.gmra.mrb[0].mxu0 %v559_v10  ;;  %519 = vmatmul.mubr.bf16.vlgmr.msra.gmra.mrb[0].mxu1 %v560_v11 }
  0x48   :  { %514 = vmatprep.mubr.bf16.mxu0 %v561_v12  ;;  %522 = vmatprep.mubr.bf16.mxu1 %v562_v13 }
  0x4f   :  { %515 = vmatmul.mubr.bf16.gmra.mrb[4].mxu0 %v563_v14  ;;  %523 = vmatmul.mubr.bf16.gmra.mrb[4].mxu1 %v564_v15 }
 0x11a   :  { %v512_v17 = vpop.f32.mrb[0].mxu0  ;;  %v520_v18 = vpop.f32.mrb[0].mxu1 }
 0x11b   :  { %v365_v19 = vadd.f32 %v512_v17, %v691_v16  ;;  %v373_v20 = vadd.f32 %v520_v18, %v691_v16  ;;  %v242_v21 = vpop.f32.mrb[1].mxu0  ;;  %v274_v22 = vpop.f32.mrb[1].mxu1 }
 0x11c   :  { %v363_v23 = vadd.f32 %v691_v16, %v242_v21  ;;  %v371_v24 = vadd.f32 %v691_v16, %v274_v22  ;;  %v513_v25 = vpop.f32.mrb[2].mxu0  ;;  %v521_v26 = vpop.f32.mrb[2].mxu1 }
 0x11d   :  { %vm381_vm0 = vcmp.gt.f32.partialorder %v365_v19, 0.0  ;;  %v397_v27 = vmul.f32 0.2, %v365_v19  ;;  %vm389_vm1 = vcmp.gt.f32.partialorder %v373_v20, 0.0  ;;  %v405_v28 = vmul.f32 0.2, %v373_v20 }
 0x11e   :  { %vm379_vm2 = vcmp.gt.f32.partialorder %v363_v23, 0.0  ;;  %v395_v29 = vmul.f32 0.2, %v363_v23  ;;  %vm387_vm3 = vcmp.gt.f32.partialorder %v371_v24, 0.0  ;;  %v403_v30 = vmul.f32 0.2, %v371_v24 }
 0x11f   :  { %v413_v31 = vsel %vm381_vm0, %v365_v19, %v397_v27  ;;  %v421_v32 = vsel %vm389_vm1, %v373_v20, %v405_v28  ;;  %v366_v33 = vadd.f32 %v513_v25, %v691_v16  ;;  %v374_v34 = vadd.f32 %v521_v26, %v691_v16  ;;  %v245_v35 = vpop.f32.mrb[3].mxu0  ;;  %v277_v36 = vpop.f32.mrb[3].mxu1 }
 0x120   :  { %429 = vst [vmem:[#allocation8 + $0x10] sm:$0xff] %v413_v31  ;;  %437 = vst [vmem:[#allocation8 + $0x50] sm:$0xff] %v421_v32  ;;  %v411_v37 = vsel %vm379_vm2, %v363_v23, %v395_v29  ;;  %v419_v38 = vsel %vm387_vm3, %v371_v24, %v403_v30  ;;  %v364_v39 = vadd.f32 %v691_v16, %v245_v35 }
 0x121   :  { %v372_v40 = vadd.f32 %v691_v16, %v277_v36  ;;  %427 = vst [vmem:[#allocation8] sm:$0xff] %v411_v37  ;;  %435 = vst [vmem:[#allocation8 + $0x40] sm:$0xff] %v419_v38  ;;  %vm382_vm4 = vcmp.gt.f32.partialorder %v366_v33, 0.0  ;;  %v398_v41 = vmul.f32 0.2, %v366_v33  ;;  %vm390_vm5 = vcmp.gt.f32.partialorder %v374_v34, 0.0 }
 0x122   :  { %v406_v42 = vmul.f32 0.2, %v374_v34  ;;  %vm380_vm6 = vcmp.gt.f32.partialorder %v364_v39, 0.0  ;;  %v396_v43 = vmul.f32 0.2, %v364_v39  ;;  %v516_v47 = vpop.f32.mrb[4].mxu0 }
 0x123   :  { %vm388_vm7 = vcmp.gt.f32.partialorder %v372_v40, 0.0  ;;  %v404_v44 = vmul.f32 0.2, %v372_v40  ;;  %v414_v45 = vsel %vm382_vm4, %v366_v33, %v398_v41  ;;  %v524_v48 = vpop.f32.mrb[4].mxu1  ;;  %v369_v51 = vadd.f32 %v516_v47, %v691_v16  ;;  %v258_v53 = vpop.f32.mrb[5].mxu0 }
 0x124   :  { %v422_v46 = vsel %vm390_vm5, %v374_v34, %v406_v42  ;;  %430 = vst [vmem:[#allocation8 + $0x18] sm:$0xff] %v414_v45  ;;  %v412_v49 = vsel %vm380_vm6, %v364_v39, %v396_v43  ;;  %v377_v52 = vadd.f32 %v524_v48, %v691_v16  ;;  %v290_v54 = vpop.f32.mrb[5].mxu1  ;;  %v367_v55 = vadd.f32 %v691_v16, %v258_v53  ;;  %v517_v57 = vpop.f32.mrb[6].mxu0 }
 0x125   :  { %438 = vst [vmem:[#allocation8 + $0x58] sm:$0xff] %v422_v46  ;;  %v420_v50 = vsel %vm388_vm7, %v372_v40, %v404_v44  ;;  %428 = vst [vmem:[#allocation8 + $0x8] sm:$0xff] %v412_v49  ;;  %v375_v56 = vadd.f32 %v691_v16, %v290_v54  ;;  %v525_v58 = vpop.f32.mrb[6].mxu1  ;;  %vm385_vm8 = vcmp.gt.f32.partialorder %v369_v51, 0.0  ;;  %v401_v59 = vmul.f32 0.2, %v369_v51 }
 0x126   :  { %436 = vst [vmem:[#allocation8 + $0x48] sm:$0xff] %v420_v50  ;;  %vm393_vm9 = vcmp.gt.f32.partialorder %v377_v52, 0.0  ;;  %v409_v60 = vmul.f32 0.2, %v377_v52  ;;  %vm383_vm10 = vcmp.gt.f32.partialorder %v367_v55, 0.0  ;;  %v370_v1 = vadd.f32 %v517_v57, %v691_v16  ;;  %v261_v3 = vpop.f32.mrb[7].mxu0 }
 0x127   :  { %v399_v61 = vmul.f32 0.2, %v367_v55  ;;  %vm391_vm11 = vcmp.gt.f32.partialorder %v375_v56, 0.0  ;;  %v407_v62 = vmul.f32 0.2, %v375_v56  ;;  %v417_v63 = vsel %vm385_vm8, %v369_v51, %v401_v59  ;;  %v293_v4 = vpop.f32.mrb[7].mxu1 }
 0x128   :  { %v425_v0 = vsel %vm393_vm9, %v377_v52, %v409_v60  ;;  %v378_v2 = vadd.f32 %v525_v58, %v691_v16  ;;  %433 = vst [vmem:[#allocation8 + $0x30] sm:$0xff] %v417_v63  ;;  %v368_v7 = vadd.f32 %v691_v16, %v261_v3  ;;  %v376_v8 = vadd.f32 %v691_v16, %v293_v4 }
 0x129   :  { %441 = vst [vmem:[#allocation8 + $0x70] sm:$0xff] %v425_v0  ;;  %v415_v5 = vsel %vm383_vm10, %v367_v55, %v399_v61  ;;  %v423_v6 = vsel %vm391_vm11, %v375_v56, %v407_v62  ;;  %vm386_vm12 = vcmp.gt.f32.partialorder %v370_v1, 0.0  ;;  %v402_v9 = vmul.f32 0.2, %v370_v1 }
 0x12a   :  { %431 = vst [vmem:[#allocation8 + $0x20] sm:$0xff] %v415_v5  ;;  %439 = vst [vmem:[#allocation8 + $0x60] sm:$0xff] %v423_v6  ;;  %vm394_vm13 = vcmp.gt.f32.partialorder %v378_v2, 0.0  ;;  %v410_v10 = vmul.f32 0.2, %v378_v2  ;;  %vm384_vm14 = vcmp.gt.f32.partialorder %v368_v7, 0.0 }
 0x12b   :  { %v400_v11 = vmul.f32 0.2, %v368_v7  ;;  %vm392_vm15 = vcmp.gt.f32.partialorder %v376_v8, 0.0  ;;  %v408_v12 = vmul.f32 0.2, %v376_v8  ;;  %v418_v13 = vsel %vm386_vm12, %v370_v1, %v402_v9 }
 0x12c   :  { %v426_v14 = vsel %vm394_vm13, %v378_v2, %v410_v10  ;;  %434 = vst [vmem:[#allocation8 + $0x38] sm:$0xff] %v418_v13 }
 0x12d   :  { %442 = vst [vmem:[#allocation8 + $0x78] sm:$0xff] %v426_v14  ;;  %v416_v15 = vsel %vm384_vm14, %v368_v7, %v400_v11  ;;  %v424_v17 = vsel %vm392_vm15, %v376_v8, %v408_v12 }
 0x12e   :  { %432 = vst [vmem:[#allocation8 + $0x28] sm:$0xff] %v416_v15  ;;  %440 = vst [vmem:[#allocation8 + $0x68] sm:$0xff] %v424_v17 }
 0x12f   :  { %620 = shalt.err (!%p617_p6)
}
 0x130   :  { %s621_s15 = scalar_lea.hbm %s724_s3, 2048 }
 0x131   :  { %p622_p7 = scmp.ne.s32.totalorder %s724_s3, %s621_s15  ;;  %p625_p8 = scmp.lt.u32.totalorder %s621_s15, %s724_s3 }
 0x133   :  { %p627_p9 = pnand %p625_p8, %p622_p7 }
 0x135   :  { %630 = shalt.err (!%p627_p9)
}
 0x136   :  { %s642_s20 = smov 128   ;;  %s643_s21 = smov 8  }
 0x137   :  { %454 = dma.vmem_to_hbm [thread:$0]  %s449_s11, 2048, %s724_s3, [#allocation5], %s642_s20, %s642_s20, %s643_s21  }
 0x138   :  { %635 = dma.done.wait [#allocation5], 2048  }
 0x139   :  { %636 = vsyncadd [#allocation5], 4294965248 }
 0x13a   :  { %458 = vsyncpa [#allocation4], 1 }
 0x13b   :  { %459 = vsyncpa [#allocation7], 1 }
 0x13c   :  { %460 = vsyncpa [#allocation5], 1 }

</bundles_post_ra>
